<compile_context>
chip_gen: v6e
topology: v6e:2x2x1
jax: 0.10.0
libtpu: 0.0.40
codegen_flags: <defaults>
</compile_context>

<pallas_src>
import jax
import jax.numpy as jnp
import numpy as np
from jax.experimental import pallas as pl
from jax.experimental.pallas import tpu as pltpu

SCALE = 0.18215  # LDM latent scale, as in the torch module


def _sign(d):
    return jnp.where(d > 0, 1.0, jnp.where(d < 0, -1.0, 0.0))


def _make_kernel(R, K):
    """R = stacked output rows (B * C_img), K = latent channels (contraction size)."""
    NT = K + 1  # column offset of the pre-negated transposed weights inside the packed params

    def kernel(x_ref, p_ref, tgt_ref, grad_ref):
        x = x_ref[...]          # [K, HW]
        p = p_ref[...]          # [max(R,K), K+1+R]  packed: W_stack | bias | -W_stack^T
        tgt = tgt_ref[...]      # [R, HW]

        # ---- fused forward, stacked over both batch elements: pre = W_stack @ x + c ----
        # K-wide contraction unrolled as VPU broadcast-FMAs (exact f32; keeps the
        # tiny matmul off the MXU entirely).
        pre = p[:R, K:K + 1]                                        # bias column [R, 1]
        for c in range(K):
            pre = pre + p[:R, c:c + 1] * x[c:c + 1, :]              # [R,1]*[1,HW] -> [R,HW]
        img = jnp.tanh(pre)                                         # decoder stand-in (EUP)

        # ---- grad modules (stand-ins), single FULL-batch NaN guard (reference semantics) ----
        diff = img - tgt
        nan_any = jnp.any(jnp.isnan(diff))
        # NOTE: must stay a select — multiplying by (1 - nan_flag) would keep NaNs (NaN*0=NaN).
        sub1 = jnp.where(nan_any, jnp.zeros_like(diff), 2.0 * diff)          # MSE-style module
        sub2 = jnp.where(diff > 0, 0.1, jnp.where(diff < 0, -0.1, 0.0))      # L1-style module
        img_grad = sub1 + sub2

        # ---- analytic VJP:  grad = (-W_stack)^T @ (img_grad * tanh'(pre)) ----
        # The contraction over the R stacked rows IS the batch accumulation; weights are
        # pre-negated host-side, so the result is stored directly (no negate, no init).
        v_pre = img_grad * (1.0 - img * img)
        g = p[:K, NT:NT + 1] * v_pre[0:1, :]
        for r in range(1, R):
            g = g + p[:K, NT + r:NT + r + 1] * v_pre[r:r + 1, :]
        grad_ref[...] = g

    return kernel


def latent_gradient_guided_conditioning(x, t, params):
    """x: [B, C, H, W] latents (NCHW), t: [B] int timesteps (original schedule).

    The torch code broadcasts out[half,...] * sigma[B,1,1,1]; that broadcast is only
    valid for half == 1, i.e. CFG-style B == 2 batches — asserted here."""
    B, C, H, W = x.shape
    half = B // 2
    assert half == 1 and B == 2, "torch broadcast semantics require B == 2, half == 1"
    HW = H * W
    C_img = params["w_dec"].shape[0]
    R = B * C_img          # stacked rows
    K = C                  # latent channels

    # t = [timestep_map.index(v) for v in t]   (glue, plain JAX)
    # NOTE: unlike torch .index(), argmax maps a missing timestep to 0 — caller must
    #       guarantee every t is present in timestep_map (checked in __main__).
    tm = params["timestep_map"]
    t_idx = jnp.argmax(tm[None, :] == t.astype(jnp.int32)[:, None], axis=-1)
    sigma = params["sqrt_one_minus_alphas_cumprod"][t_idx].astype(jnp.float32)   # [B]

    wm = params["w_model"].astype(jnp.float32)   # [C, C]
    bm = params["b_model"].astype(jnp.float32)   # [C, 1]
    wd = params["w_dec"].astype(jnp.float32)     # [C_img, C]
    bd = params["b_dec"].astype(jnp.float32)     # [C_img, 1]

    # Host-side algebraic fusion of blend + decode into per-sigma effective 1x1 convs:
    #   A_s = s*wm + (1-s)*I ; W_eff = wd @ A_s / SCALE ; c_eff = s*(wd@bm)/SCALE + bd
    eye = jnp.eye(C, dtype=jnp.float32)
    A = sigma[:, None, None] * wm[None] + (1.0 - sigma)[:, None, None] * eye[None]   # [B,C,C]
    w_eff = jnp.einsum("oc,bcd->bod", wd, A) / SCALE                                 # [B,C_img,C]
    c_eff = sigma[:, None, None] * (wd @ bm)[None] / SCALE + bd[None]                # [B,C_img,1]

    W_stack = w_eff.reshape(R, K)   # stacked forward weights     [R, K]
    c_stack = c_eff.reshape(R)      # stacked forward bias        [R]

    # One packed params array (a single padded VMEM tile) -> fewer prologue DMAs:
    #   cols [0:K) = W_stack, col K = bias, cols [K+1 : K+1+R) = -W_stack^T (pre-negated)
    P = jnp.zeros((max(R, K), K + 1 + R), jnp.float32)
    P = P.at[:R, :K].set(W_stack)
    P = P.at[:R, K].set(c_stack)
    P = P.at[:K, K + 1:].set(-W_stack.T)

    x2d = x[0].reshape(K, HW).astype(jnp.float32)                    # half-batch latent [K, HW]
    tgt = params["targets"].reshape(R, HW).astype(jnp.float32)       # stacked targets   [R, HW]

    vmem = lambda: pl.BlockSpec(memory_space=pltpu.MemorySpace.VMEM)
    grad = pl.pallas_call(
        _make_kernel(R, K),
        out_shape=jax.ShapeDtypeStruct((K, HW), jnp.float32),
        in_specs=[vmem(), vmem(), vmem()],
        out_specs=vmem(),
    )(x2d, P, tgt)

    return grad.reshape(half, C, H, W)


def _reference(x, t, params):
    """Pure-JAX reference: same forward + jax.vjp for the gradient."""
    B, C, H, W = x.shape
    half = B // 2
    tm = params["timestep_map"]
    t_idx = jnp.argmax(tm[None, :] == t.astype(jnp.int32)[:, None], axis=-1)
    sigma = params["sqrt_one_minus_alphas_cumprod"][t_idx].reshape(-1, 1, 1, 1)
    xh = x[:half].astype(jnp.float32)

    def chain(xv):
        pred = jnp.einsum("oc,bchw->bohw", params["w_model"], xv) \
               + params["b_model"].reshape(1, -1, 1, 1)
        out = pred * sigma + xv * (1.0 - sigma)          # broadcast half -> B
        z = out / SCALE
        img = jnp.tanh(jnp.einsum("oc,bchw->bohw", params["w_dec"], z)
                       + params["b_dec"].reshape(1, -1, 1, 1))
        return img

    img, vjp = jax.vjp(chain, xh)
    tgt = params["targets"]
    sub1 = 2.0 * (img - tgt)
    sub1 = jnp.where(jnp.any(jnp.isnan(sub1)), jnp.zeros_like(sub1), sub1)
    sub2 = 0.1 * _sign(img - tgt)
    sub2 = jnp.where(jnp.any(jnp.isnan(sub2)), jnp.zeros_like(sub2), sub2)
    img_grad = sub1 + sub2
    return -vjp(img_grad)[0]


if __name__ == "__main__":
    B, C_lat, C_img, H, W = 2, 4, 3, 16, 16

    key = jax.random.PRNGKey(0)
    k1, k2, k3, k4, k5, k6 = jax.random.split(key, 6)
    params = {
        # deterministic synthetic "weights" (stand-ins for external networks)
        "w_model": 0.2 * jax.random.normal(k1, (C_lat, C_lat), jnp.float32),
        "b_model": 0.05 * jax.random.normal(k2, (C_lat, 1), jnp.float32),
        "w_dec": 0.3 * jax.random.normal(k3, (C_img, C_lat), jnp.float32),
        "b_dec": 0.05 * jax.random.normal(k4, (C_img, 1), jnp.float32),
        "targets": 0.5 * jax.random.normal(k5, (B, C_img, H, W), jnp.float32),
        # synthetic respaced diffusion schedule (10 steps)
        "timestep_map": jnp.arange(0, 1000, 100, dtype=jnp.int32),
        "sqrt_one_minus_alphas_cumprod": jnp.linspace(0.05, 0.98, 10).astype(jnp.float32),
    }

    x = jax.random.normal(k6, (B, C_lat, H, W), jnp.float32)   # NCHW latents
    t = jnp.array([300, 700], dtype=jnp.int32)                 # original-schedule timesteps

    # torch's timestep_map.index(t) raises on a missing timestep; argmax would silently
    # map it to 0 — check explicitly on the host before calling.
    assert np.all(np.isin(np.asarray(t), np.asarray(params["timestep_map"]))), \
        "timestep not present in timestep_map"

    lggc = jax.jit(latent_gradient_guided_conditioning)
    grad = jax.block_until_ready(lggc(x, t, params))

    ref = jax.block_until_ready(_reference(x, t, params))
    assert grad.shape == (B // 2, C_lat, H, W)
    # tolerance: kernel uses the algebraically-fused weights, so float rounding
    # differs slightly from the unfused reference chain.
    np.testing.assert_allclose(np.asarray(grad), np.asarray(ref), rtol=1e-4, atol=1e-4)

    print("KERNEL_OK")
</pallas_src>

<mosaic_0001>
module attributes {stable_mosaic.version = 11 : i64} {
  func.func @kernel(%arg0: memref<4x256xf32, #tpu.memory_space<vmem>>, %arg1: memref<6x11xf32, #tpu.memory_space<vmem>>, %arg2: memref<6x256xf32, #tpu.memory_space<vmem>>, %arg3: memref<4x256xf32, #tpu.memory_space<vmem>>) attributes {dimension_semantics = [], scalar_prefetch = 0 : i64, scratch_operands = 0 : i64, tpu.core_type = #tpu.core_type<tc>} {
    %c0 = arith.constant 0 : index
    %c0_0 = arith.constant 0 : index
    %0 = vector.load %arg0[%c0, %c0_0] : memref<4x256xf32, #tpu.memory_space<vmem>>, vector<4x256xf32>
    %c0_1 = arith.constant 0 : index
    %c0_2 = arith.constant 0 : index
    %1 = vector.load %arg1[%c0_1, %c0_2] : memref<6x11xf32, #tpu.memory_space<vmem>>, vector<6x11xf32>
    %c0_3 = arith.constant 0 : index
    %c0_4 = arith.constant 0 : index
    %2 = vector.load %arg2[%c0_3, %c0_4] : memref<6x256xf32, #tpu.memory_space<vmem>>, vector<6x256xf32>
    %3 = vector.extract_strided_slice %1 {offsets = [0, 4], sizes = [6, 1], strides = [1, 1]} : vector<6x11xf32> to vector<6x1xf32>
    %4 = vector.extract_strided_slice %1 {offsets = [0, 0], sizes = [6, 1], strides = [1, 1]} : vector<6x11xf32> to vector<6x1xf32>
    %5 = vector.extract_strided_slice %0 {offsets = [0, 0], sizes = [1, 256], strides = [1, 1]} : vector<4x256xf32> to vector<1x256xf32>
    %6 = vector.broadcast %4 : vector<6x1xf32> to vector<6x256xf32>
    %7 = vector.broadcast %5 : vector<1x256xf32> to vector<6x256xf32>
    %8 = arith.mulf %6, %7 : vector<6x256xf32>
    %9 = vector.broadcast %3 : vector<6x1xf32> to vector<6x256xf32>
    %10 = arith.addf %9, %8 : vector<6x256xf32>
    %11 = vector.extract_strided_slice %1 {offsets = [0, 1], sizes = [6, 1], strides = [1, 1]} : vector<6x11xf32> to vector<6x1xf32>
    %12 = vector.extract_strided_slice %0 {offsets = [1, 0], sizes = [1, 256], strides = [1, 1]} : vector<4x256xf32> to vector<1x256xf32>
    %13 = vector.broadcast %11 : vector<6x1xf32> to vector<6x256xf32>
    %14 = vector.broadcast %12 : vector<1x256xf32> to vector<6x256xf32>
    %15 = arith.mulf %13, %14 : vector<6x256xf32>
    %16 = arith.addf %10, %15 : vector<6x256xf32>
    %17 = vector.extract_strided_slice %1 {offsets = [0, 2], sizes = [6, 1], strides = [1, 1]} : vector<6x11xf32> to vector<6x1xf32>
    %18 = vector.extract_strided_slice %0 {offsets = [2, 0], sizes = [1, 256], strides = [1, 1]} : vector<4x256xf32> to vector<1x256xf32>
    %19 = vector.broadcast %17 : vector<6x1xf32> to vector<6x256xf32>
    %20 = vector.broadcast %18 : vector<1x256xf32> to vector<6x256xf32>
    %21 = arith.mulf %19, %20 : vector<6x256xf32>
    %22 = arith.addf %16, %21 : vector<6x256xf32>
    %23 = vector.extract_strided_slice %1 {offsets = [0, 3], sizes = [6, 1], strides = [1, 1]} : vector<6x11xf32> to vector<6x1xf32>
    %24 = vector.extract_strided_slice %0 {offsets = [3, 0], sizes = [1, 256], strides = [1, 1]} : vector<4x256xf32> to vector<1x256xf32>
    %25 = vector.broadcast %23 : vector<6x1xf32> to vector<6x256xf32>
    %26 = vector.broadcast %24 : vector<1x256xf32> to vector<6x256xf32>
    %27 = arith.mulf %25, %26 : vector<6x256xf32>
    %28 = arith.addf %22, %27 : vector<6x256xf32>
    %29 = math.tanh %28 : vector<6x256xf32>
    %30 = arith.subf %29, %2 : vector<6x256xf32>
    %31 = arith.cmpf one, %30, %30 : vector<6x256xf32>
    %cst = arith.constant 1.000000e+00 : f32
    %cst_5 = arith.constant 0.000000e+00 : f32
    %32 = vector.broadcast %cst : f32 to vector<6x256xf32>
    %33 = vector.broadcast %cst_5 : f32 to vector<6x256xf32>
    %34 = arith.select %31, %32, %33 : vector<6x256xi1>, vector<6x256xf32>
    %35 = vector.shape_cast %34 : vector<6x256xf32> to vector<1x6x256xf32>
    %cst_6 = arith.constant dense<0xFF800000> : vector<1xf32>
    %36 = vector.multi_reduction <maximumf>, %35, %cst_6 [1, 2] : vector<1x6x256xf32> to vector<1xf32>
    %37 = vector.shape_cast %36 : vector<1xf32> to vector<1x1x1xf32>
    %38 = vector.extract %37[0, 0, 0] : f32 from vector<1x1x1xf32>
    %cst_7 = arith.constant 0.000000e+00 : f32
    %39 = arith.cmpf ogt, %38, %cst_7 : f32
    %cst_8 = arith.constant 0.000000e+00 : f32
    %40 = vector.broadcast %cst_8 : f32 to vector<6x256xf32>
    %cst_9 = arith.constant 2.000000e+00 : f32
    %41 = vector.broadcast %cst_9 : f32 to vector<6x256xf32>
    %42 = arith.mulf %41, %30 : vector<6x256xf32>
    %43 = arith.select %39, %40, %42 : vector<6x256xf32>
    %cst_10 = arith.constant 0.000000e+00 : f32
    %44 = vector.broadcast %cst_10 : f32 to vector<6x256xf32>
    %45 = arith.cmpf ogt, %30, %44 : vector<6x256xf32>
    %cst_11 = arith.constant 0.000000e+00 : f32
    %46 = vector.broadcast %cst_11 : f32 to vector<6x256xf32>
    %47 = arith.cmpf olt, %30, %46 : vector<6x256xf32>
    %cst_12 = arith.constant -1.000000e-01 : f32
    %cst_13 = arith.constant 0.000000e+00 : f32
    %48 = vector.broadcast %cst_12 : f32 to vector<6x256xf32>
    %49 = vector.broadcast %cst_13 : f32 to vector<6x256xf32>
    %50 = arith.select %47, %48, %49 : vector<6x256xi1>, vector<6x256xf32>
    %cst_14 = arith.constant 1.000000e-01 : f32
    %51 = vector.broadcast %cst_14 : f32 to vector<6x256xf32>
    %52 = arith.select %45, %51, %50 : vector<6x256xi1>, vector<6x256xf32>
    %53 = arith.addf %43, %52 : vector<6x256xf32>
    %54 = arith.mulf %29, %29 : vector<6x256xf32>
    %cst_15 = arith.constant 1.000000e+00 : f32
    %55 = vector.broadcast %cst_15 : f32 to vector<6x256xf32>
    %56 = arith.subf %55, %54 : vector<6x256xf32>
    %57 = arith.mulf %53, %56 : vector<6x256xf32>
    %58 = vector.extract_strided_slice %1 {offsets = [0, 5], sizes = [4, 1], strides = [1, 1]} : vector<6x11xf32> to vector<4x1xf32>
    %59 = vector.extract_strided_slice %57 {offsets = [0, 0], sizes = [1, 256], strides = [1, 1]} : vector<6x256xf32> to vector<1x256xf32>
    %60 = vector.broadcast %58 : vector<4x1xf32> to vector<4x256xf32>
    %61 = vector.broadcast %59 : vector<1x256xf32> to vector<4x256xf32>
    %62 = arith.mulf %60, %61 : vector<4x256xf32>
    %63 = vector.extract_strided_slice %1 {offsets = [0, 6], sizes = [4, 1], strides = [1, 1]} : vector<6x11xf32> to vector<4x1xf32>
    %64 = vector.extract_strided_slice %57 {offsets = [1, 0], sizes = [1, 256], strides = [1, 1]} : vector<6x256xf32> to vector<1x256xf32>
    %65 = vector.broadcast %63 : vector<4x1xf32> to vector<4x256xf32>
    %66 = vector.broadcast %64 : vector<1x256xf32> to vector<4x256xf32>
    %67 = arith.mulf %65, %66 : vector<4x256xf32>
    %68 = arith.addf %62, %67 : vector<4x256xf32>
    %69 = vector.extract_strided_slice %1 {offsets = [0, 7], sizes = [4, 1], strides = [1, 1]} : vector<6x11xf32> to vector<4x1xf32>
    %70 = vector.extract_strided_slice %57 {offsets = [2, 0], sizes = [1, 256], strides = [1, 1]} : vector<6x256xf32> to vector<1x256xf32>
    %71 = vector.broadcast %69 : vector<4x1xf32> to vector<4x256xf32>
    %72 = vector.broadcast %70 : vector<1x256xf32> to vector<4x256xf32>
    %73 = arith.mulf %71, %72 : vector<4x256xf32>
    %74 = arith.addf %68, %73 : vector<4x256xf32>
    %75 = vector.extract_strided_slice %1 {offsets = [0, 8], sizes = [4, 1], strides = [1, 1]} : vector<6x11xf32> to vector<4x1xf32>
    %76 = vector.extract_strided_slice %57 {offsets = [3, 0], sizes = [1, 256], strides = [1, 1]} : vector<6x256xf32> to vector<1x256xf32>
    %77 = vector.broadcast %75 : vector<4x1xf32> to vector<4x256xf32>
    %78 = vector.broadcast %76 : vector<1x256xf32> to vector<4x256xf32>
    %79 = arith.mulf %77, %78 : vector<4x256xf32>
    %80 = arith.addf %74, %79 : vector<4x256xf32>
    %81 = vector.extract_strided_slice %1 {offsets = [0, 9], sizes = [4, 1], strides = [1, 1]} : vector<6x11xf32> to vector<4x1xf32>
    %82 = vector.extract_strided_slice %57 {offsets = [4, 0], sizes = [1, 256], strides = [1, 1]} : vector<6x256xf32> to vector<1x256xf32>
    %83 = vector.broadcast %81 : vector<4x1xf32> to vector<4x256xf32>
    %84 = vector.broadcast %82 : vector<1x256xf32> to vector<4x256xf32>
    %85 = arith.mulf %83, %84 : vector<4x256xf32>
    %86 = arith.addf %80, %85 : vector<4x256xf32>
    %87 = vector.extract_strided_slice %1 {offsets = [0, 10], sizes = [4, 1], strides = [1, 1]} : vector<6x11xf32> to vector<4x1xf32>
    %88 = vector.extract_strided_slice %57 {offsets = [5, 0], sizes = [1, 256], strides = [1, 1]} : vector<6x256xf32> to vector<1x256xf32>
    %89 = vector.broadcast %87 : vector<4x1xf32> to vector<4x256xf32>
    %90 = vector.broadcast %88 : vector<1x256xf32> to vector<4x256xf32>
    %91 = arith.mulf %89, %90 : vector<4x256xf32>
    %92 = arith.addf %86, %91 : vector<4x256xf32>
    %c0_16 = arith.constant 0 : index
    %c0_17 = arith.constant 0 : index
    %93 = vector.load %arg3[%c0_16, %c0_17] : memref<4x256xf32, #tpu.memory_space<vmem>>, vector<4x256xf32>
    tpu.vector_store %arg3[%c0_16, %c0_17], %92 {strides = array<i32>} : memref<4x256xf32, #tpu.memory_space<vmem>>, vector<4x256xf32>,
    return
  }
}

</mosaic_0001>

<bundles_post_ra>
// kernel: squeeze.1
= control target key start
LH: loop header
LB: loop body
LE: loop exit
PB: predicated region body
PF: predicated region fallthrough
CT: control target
= control target key end

     0   :  { %s15_s6 = smov 3  ;;  %s18_s7 = smov 12  ;;  %vm20_vm0 = vcmask 1043458   ;;  %vm25_vm1 = vcmask 1045508   ;;  %vm30_vm2 = vcmask 1047558   ;;  %vm4_vm3 = vcmask 1047556   ;;  %s367_s0 = inlined_call_operand.vmem [shape: f32[1,4,16,16], index: 0, kind: input, shape index: {}]   ;;  %s368_s1 = inlined_call_operand.vmem [shape: f32[4,256], index: 1, kind: output, shape index: {}]  }
   0x1   :  { %v196_v0 = vld [vmem:[%s367_s0 + $0x7] ss:$16 sm:%s15_s6]   ;;  %s23_s12 = smov 48  ;;  %s28_s13 = smov 192  ;;  %vm6_vm4 = vcmask 130048   ;;  %vm34_vm5 = vcmask 1048448  }
   0x2   :  { %v197_v1 = vld [vmem:[%s367_s0 + $0x7] ss:$16 sm:%s18_s7]   ;;  %v198_v3 = vld [vmem:[%s367_s0 - $0x31] ss:$16 sm:%s23_s12]   ;;  %s63_s18 = smov 3  ;;  %s66_s21 = smov 12 }
   0x3   :  { %v21_v2 = vsel %vm20_vm0, %v197_v1, %v196_v0  ;;  %v199_v4 = vld [vmem:[%s367_s0 - $0x31] ss:$16 sm:%s28_s13]   ;;  %v204_v6 = vld [vmem:[%s367_s0 + $0x5] ss:$16 sm:%s63_s18]   ;;  %s71_s22 = smov 48  ;;  %s76_s27 = smov 192 }
   0x4   :  { %v26_v5 = vsel %vm25_vm1, %v198_v3, %v21_v2  ;;  %v205_v8 = vld [vmem:[%s367_s0 + $0x5] ss:$16 sm:%s66_s21]   ;;  %v206_v9 = vld [vmem:[%s367_s0 - $0x33] ss:$16 sm:%s71_s22]   ;;  %s232_s28 = smov 112   ;;  %s39_s2 = smov 3 }
   0x5   :  { %v31_v7 = vsel %vm30_vm2, %v199_v4, %v26_v5  ;;  %v69_v10 = vsel %vm20_vm0, %v205_v8, %v204_v6  ;;  %v207_v11 = vld [vmem:[%s367_s0 - $0x33] ss:$16 sm:%s76_s27]   ;;  %s42_s3 = smov 12  ;;  %v200_v13 = vld [vmem:[%s367_s0 + $0x6] ss:$16 sm:%s39_s2]   ;;  %s47_s8 = smov 48 }
   0x6   :  { %32 = vrot.lane.b32.xlu0 %v31_v7, %s232_s28  ;;  %v74_v12 = vsel %vm25_vm1, %v206_v9, %v69_v10  ;;  %v201_v14 = vld [vmem:[%s367_s0 + $0x6] ss:$16 sm:%s42_s3]   ;;  %s52_s9 = smov 192  ;;  %s87_s14 = smov 3  ;;  %vm58_vm6 = vcmask 917248   ;;  %vm82_vm7 = vcmask 786048  }
   0x7   :  { %v79_v15 = vsel %vm30_vm2, %v207_v11, %v74_v12  ;;  %v45_v16 = vsel %vm20_vm0, %v201_v14, %v200_v13  ;;  %v202_v17 = vld [vmem:[%s367_s0 - $0x32] ss:$16 sm:%s47_s8]   ;;  %s233_s15 = smov 80   ;;  %v208_v20 = vld [vmem:[%s367_s0 + $0x4] ss:$16 sm:%s87_s14]   ;;  %s90_s18 = smov 12 }
   0x8   :  { %v203_v18 = vld [vmem:[%s367_s0 - $0x32] ss:$16 sm:%s52_s9]   ;;  %80 = vrot.lane.b32.xlu1 %v79_v15, %s233_s15  ;;  %v50_v19 = vsel %vm25_vm1, %v202_v17, %v45_v16  ;;  %s95_s19 = smov 48  ;;  %s100_s24 = smov 192  ;;  %vm106_vm8 = vcmask 654848   ;;  %vm130_vm9 = vcmask 523648  }
   0x9   :  { %v55_v21 = vsel %vm30_vm2, %v203_v18, %v50_v19  ;;  %v209_v22 = vld [vmem:[%s367_s0 + $0x4] ss:$16 sm:%s90_s18]   ;;  %v210_v23 = vld [vmem:[%s367_s0 - $0x34] ss:$16 sm:%s95_s19]   ;;  %s234_s25 = smov 96   ;;  %s111_s28 = smov 3 }
   0xa   :  { %56 = vrot.lane.b32.xlu0 %v55_v21, %s234_s25  ;;  %v93_v24 = vsel %vm20_vm0, %v209_v22, %v208_v20  ;;  %v211_v25 = vld [vmem:[%s367_s0 - $0x34] ss:$16 sm:%s100_s24]   ;;  %s114_s29 = smov 12  ;;  %s119_s5 = smov 48  ;;  %vm154_vm10 = vcmask 392448   ;;  %vm178_vm11 = vcmask 261248  }
   0xb   :  { %v98_v26 = vsel %vm25_vm1, %v210_v23, %v93_v24  ;;  %v212_v27 = vld [vmem:[%s367_s0 + $0x3] ss:$16 sm:%s111_s28]   ;;  %s124_s6 = smov 192  ;;  %v214_v31 = vld [vmem:[%s367_s0 - $0x35] ss:$16 sm:%s119_s5]   ;;  %s135_s11 = smov 3 }
   0xc   :  { %v213_v28 = vld [vmem:[%s367_s0 + $0x3] ss:$16 sm:%s114_s29]   ;;  %v103_v29 = vsel %vm30_vm2, %v211_v25, %v98_v26  ;;  %v215_v32 = vld [vmem:[%s367_s0 - $0x35] ss:$16 sm:%s124_s6]   ;;  %s235_s12 = smov 64   ;;  %s138_s15 = smov 12 }
   0xd   :  { %v117_v30 = vsel %vm20_vm0, %v213_v28, %v212_v27  ;;  %104 = vrot.lane.b32.xlu1 %v103_v29, %s235_s12  ;;  %v216_v34 = vld [vmem:[%s367_s0 + $0x2] ss:$16 sm:%s135_s11]   ;;  %s143_s16 = smov 48  ;;  %s148_s21 = smov 192 }
   0xe   :  { %v122_v33 = vsel %vm25_vm1, %v214_v31, %v117_v30  ;;  %v217_v36 = vld [vmem:[%s367_s0 + $0x2] ss:$16 sm:%s138_s15]   ;;  %v218_v37 = vld [vmem:[%s367_s0 - $0x36] ss:$16 sm:%s143_s16]   ;;  %s236_s22 = smov 48   ;;  %s159_s25 = smov 3 }
   0xf   :  { %v127_v35 = vsel %vm30_vm2, %v215_v32, %v122_v33  ;;  %v141_v38 = vsel %vm20_vm0, %v217_v36, %v216_v34  ;;  %v219_v39 = vld [vmem:[%s367_s0 - $0x36] ss:$16 sm:%s148_s21]   ;;  %s162_s26 = smov 12  ;;  %v220_v41 = vld [vmem:[%s367_s0 + $0x1] ss:$16 sm:%s159_s25]   ;;  %s167_s2 = smov 48 }
  0x10   :  { %128 = vrot.lane.b32.xlu0 %v127_v35, %s236_s22  ;;  %v146_v40 = vsel %vm25_vm1, %v218_v37, %v141_v38  ;;  %v221_v42 = vld [vmem:[%s367_s0 + $0x1] ss:$16 sm:%s162_s26]   ;;  %s172_s3 = smov 192  ;;  %s237_s8 = smov 32  }
  0x11   :  { %v151_v43 = vsel %vm30_vm2, %v219_v39, %v146_v40  ;;  %v165_v44 = vsel %vm20_vm0, %v221_v42, %v220_v41  ;;  %v222_v45 = vld [vmem:[%s367_s0 - $0x37] ss:$16 sm:%s167_s2]   ;;  %v2_v48 = vld [vmem:[%s367_s0] ss:$8 sm:$0xf]  }
  0x12   :  { %v223_v46 = vld [vmem:[%s367_s0 - $0x37] ss:$16 sm:%s172_s3]   ;;  %152 = vrot.lane.b32.xlu1 %v151_v43, %s237_s8  ;;  %v170_v47 = vsel %vm25_vm1, %v222_v45, %v165_v44  ;;  %v3_v49 = vld [vmem:[%s367_s0] ss:$8 sm:$0xf0]   ;;  %s238_s0 = smov 16  }
  0x13   :  { %v175_v50 = vsel %vm30_vm2, %v223_v46, %v170_v47  ;;  %v5_v51 = vsel %vm4_vm3, %v3_v49, %v2_v48 }
  0x14   :  { %176 = vrot.lane.b32.xlu0 %v175_v50, %s238_s0  ;;  %7 = vst.msk [vmem:[#allocation0] ss:$8 sm:$0x3] %vm6_vm4, %v5_v51   ;;  %9 = vst.msk [vmem:[#allocation0 - $0xf] ss:$8 sm:$0xc] %vm6_vm4, %v5_v51  }
  0x15   :  { %11 = vst.msk [vmem:[#allocation0 - $0x1e] ss:$8 sm:$0x30] %vm6_vm4, %v5_v51   ;;  %13 = vst.msk [vmem:[#allocation0 - $0x2d] ss:$8 sm:$0xc0] %vm6_vm4, %v5_v51  }
  0x78   :  { %v33_v52 = vpop.permute.xlu0 %32  }
  0x79   :  { %35 = vst.msk [vmem:[#allocation0] sm:$0xf] %vm34_vm5, %v33_v52   ;;  %37 = vst.msk [vmem:[#allocation0 + $0x4] sm:$0xf0] %vm34_vm5, %v33_v52  }
  0x7a   :  { %v81_v53 = vpop.permute.xlu1 %80  }
  0x7c   :  { %v57_v54 = vpop.permute.xlu0 %56  }
  0x7d   :  { %59 = vst.msk [vmem:[#allocation0] sm:$0xf] %vm58_vm6, %v57_v54   ;;  %61 = vst.msk [vmem:[#allocation0 + $0x4] sm:$0xf0] %vm58_vm6, %v57_v54  }
  0x7e   :  { %83 = vst.msk [vmem:[#allocation0] sm:$0xf] %vm82_vm7, %v81_v53   ;;  %85 = vst.msk [vmem:[#allocation0 + $0x4] sm:$0xf0] %vm82_vm7, %v81_v53  }
  0x7f   :  { %v105_v55 = vpop.permute.xlu1 %104  }
  0x80   :  { %107 = vst.msk [vmem:[#allocation0] sm:$0xf] %vm106_vm8, %v105_v55   ;;  %109 = vst.msk [vmem:[#allocation0 + $0x4] sm:$0xf0] %vm106_vm8, %v105_v55  }
  0x82   :  { %v129_v56 = vpop.permute.xlu0 %128  }
  0x83   :  { %131 = vst.msk [vmem:[#allocation0] sm:$0xf] %vm130_vm9, %v129_v56   ;;  %133 = vst.msk [vmem:[#allocation0 + $0x4] sm:$0xf0] %vm130_vm9, %v129_v56  }
  0x84   :  { %v153_v57 = vpop.permute.xlu1 %152  }
  0x85   :  { %155 = vst.msk [vmem:[#allocation0] sm:$0xf] %vm154_vm10, %v153_v57   ;;  %157 = vst.msk [vmem:[#allocation0 + $0x4] sm:$0xf0] %vm154_vm10, %v153_v57  }
  0x86   :  { %v177_v58 = vpop.permute.xlu0 %176  }
  0x87   :  { %179 = vst.msk [vmem:[#allocation0] sm:$0xf] %vm178_vm11, %v177_v58   ;;  %181 = vst.msk [vmem:[#allocation0 + $0x4] sm:$0xf0] %vm178_vm11, %v177_v58  }
  0x8e   :  { %v186_v59 = vld [vmem:[#allocation0] sm:$0xf]  ;;  %v191_v60 = vld [vmem:[#allocation0 + $0x8] sm:$0xf] }
  0x8f   :  { %189 = vst [vmem:[%s368_s1] sm:$0xf] %v186_v59  ;;  %224 = vst [vmem:[%s368_s1 + $0x4] sm:$0xf] %v191_v60 }

// kernel: latent_gradient_guided_conditioning.1
= control target key start
LH: loop header
LB: loop body
LE: loop exit
PB: predicated region body
PF: predicated region fallthrough
CT: control target
= control target key end

     0   :  { %v306_v0 = vmov 1   ;;  %v307_v1 = vmov 0   ;;  %v308_v3 = vmov 2   ;;  %v309_v4 = vmov 4   ;;  %s391_s1 = inlined_call_operand.vmem [shape: f32[6,11], index: 1, kind: input, shape index: {}]   ;;  %s392_s0 = inlined_call_operand.vmem [shape: f32[4,256], index: 0, kind: input, shape index: {}]   ;;  %s393_s2 = inlined_call_operand.vmem [shape: f32[6,256], index: 2, kind: input, shape index: {}]   ;;  %s394_s3 = inlined_call_operand.vmem [shape: f32[4,256], index: 3, kind: output, shape index: {}]  }
   0x1   :  { %292 = vset.pattern.permute.xlu1 %v306_v0  ;;  %290 = vset.pattern.permute.xlu0 %v307_v1  ;;  %v15_v2 = vld [vmem:[%s391_s1] sm:$0x3f]  ;;  %v310_v5 = vmov 3   ;;  %v311_v6 = vmov 5   ;;  %v312_v7 = vmov 10   ;;  %v313_v8 = vmov 6  }
   0x2   :  { %51 = vperm.xlu1 %292, %v15_v2   ;;  %20 = vperm.xlu0 %290, %v15_v2   ;;  %v314_v9 = vmov 7   ;;  %v315_v10 = vmov 8   ;;  %v316_v11 = vmov 9   ;;  %v24_v12 = vlaneseq  ;;  %v14_v16 = vld [vmem:[%s392_s0] sm:$0xff]  ;;  %v17_v61 = vld [vmem:[%s393_s2 + $0x8] sm:$0x3f] }
   0x3   :  { %v16_v60 = vld [vmem:[%s393_s2] sm:$0x3f]  ;;  %vm136_vm0 = vcmask 1045504  }
   0x4   :  { %v25_v13 = vshrl.u32 %v24_v12, 7 }
   0x6   :  { %293 = vset.pattern.permute.xlu1 %v308_v3  ;;  %291 = vset.pattern.permute.xlu0 %v309_v4  ;;  %v341_v14 = vsub.s32 0, %v25_v13  ;;  %v343_v15 = vsub.s32 4, %v25_v13  ;;  %v348_v17 = vsub.s32 1, %v25_v13  ;;  %v350_v18 = vsub.s32 5, %v25_v13 }
   0x7   :  { %77 = vperm.xlu1 %293, %v15_v2   ;;  %45 = vperm.xlu0 %291, %v15_v2   ;;  %v354_v21 = vsub.s32 2, %v25_v13  ;;  %v86_v22 = vsub.s32 6, %v25_v13  ;;  %v358_v25 = vsub.s32 3, %v25_v13  ;;  %v112_v26 = vsub.s32 7, %v25_v13 }
   0x8   :  { %v27_v19 = vrot.slane %v14_v16, %v341_v14  ;;  %v31_v20 = vrot.slane %v14_v16, %v343_v15  ;;  %v57_v23 = vrot.slane %v14_v16, %v348_v17  ;;  %v61_v24 = vrot.slane %v14_v16, %v350_v18 }
   0x9   :  { %v83_v31 = vrot.slane %v14_v16, %v354_v21  ;;  %v87_v32 = vrot.slane %v14_v16, %v86_v22  ;;  %v109_v35 = vrot.slane %v14_v16, %v358_v25  ;;  %v113_v36 = vrot.slane %v14_v16, %v112_v26 }
   0xa   :  { %v37_v29 = vrot.slane %v27_v19, %v341_v14  ;;  %v41_v30 = vrot.slane %v31_v20, %v341_v14  ;;  %v67_v33 = vrot.slane %v57_v23, %v348_v17  ;;  %v71_v34 = vrot.slane %v61_v24, %v348_v17 }
   0xb   :  { %294 = vset.pattern.permute.xlu1 %v310_v5  ;;  %301 = vset.pattern.permute.xlu0 %v312_v7  ;;  %v93_v39 = vrot.slane %v83_v31, %v354_v21  ;;  %v97_v40 = vrot.slane %v87_v32, %v354_v21  ;;  %v119_v47 = vrot.slane %v109_v35, %v358_v25 }
   0xc   :  { %103 = vperm.xlu1 %294, %v15_v2   ;;  %v123_v48 = vrot.slane %v113_v36, %v358_v25 }
  0x10   :  { %295 = vset.pattern.permute.xlu1 %v311_v6 }
  0x11   :  { %174 = vperm.xlu1 %295, %v15_v2  }
  0x15   :  { %296 = vset.pattern.permute.xlu1 %v313_v8 }
  0x16   :  { %188 = vperm.xlu1 %296, %v15_v2  }
  0x1a   :  { %297 = vset.pattern.permute.xlu1 %v314_v9 }
  0x1b   :  { %204 = vperm.xlu1 %297, %v15_v2  }
  0x1f   :  { %298 = vset.pattern.permute.xlu1 %v315_v10 }
  0x20   :  { %220 = vperm.xlu1 %298, %v15_v2  }
  0x24   :  { %299 = vset.pattern.permute.xlu1 %v316_v11 }
  0x25   :  { %236 = vperm.xlu1 %299, %v15_v2  }
  0x29   :  { %300 = vset.pattern.permute.xlu1 %v312_v7 }
  0x2a   :  { %252 = vperm.xlu1 %300, %v15_v2   ;;  %v317_v2 = vmov 0.0  }
  0x7d   :  { %v52_v27 = vpop.permute.xlu1 %51  ;;  %v21_v28 = vpop.permute.xlu0 %20 }
  0x7e   :  { %v42_v37 = vmul.f32 %v37_v29, %v21_v28  ;;  %v43_v38 = vmul.f32 %v41_v30, %v21_v28  ;;  %v72_v43 = vmul.f32 %v67_v33, %v52_v27  ;;  %v73_v44 = vmul.f32 %v71_v34, %v52_v27 }
  0x82   :  { %v78_v41 = vpop.permute.xlu1 %77  ;;  %v46_v42 = vpop.permute.xlu0 %45 }
  0x83   :  { %v48_v45 = vadd.f32 %v46_v42, %v42_v37  ;;  %v49_v46 = vadd.f32 %v46_v42, %v43_v38  ;;  %v98_v49 = vmul.f32 %v93_v39, %v78_v41  ;;  %v99_v50 = vmul.f32 %v97_v40, %v78_v41 }
  0x85   :  { %v74_v51 = vadd.f32 %v72_v43, %v48_v45  ;;  %v75_v52 = vadd.f32 %v73_v44, %v49_v46 }
  0x87   :  { %v104_v53 = vpop.permute.xlu1 %103  ;;  %v100_v54 = vadd.f32 %v98_v49, %v74_v51  ;;  %v101_v55 = vadd.f32 %v99_v50, %v75_v52 }
  0x88   :  { %v124_v56 = vmul.f32 %v119_v47, %v104_v53  ;;  %v125_v57 = vmul.f32 %v123_v48, %v104_v53 }
  0x8a   :  { %v126_v58 = vadd.f32 %v124_v56, %v100_v54  ;;  %v127_v59 = vadd.f32 %v125_v57, %v101_v55 }
  0x8c   :  { %302 = vtanh.f32 %v126_v58  ;;  %v175_v24 = vpop.permute.xlu1 %174 }
  0x8d   :  { %304 = vtanh.f32 %v127_v59 }
  0x91   :  { %v189_v26 = vpop.permute.xlu1 %188 }
  0x96   :  { %v205_v27 = vpop.permute.xlu1 %204 }
  0x99   :  { %v303_v62 = vpop.eup %302 }
  0x9a   :  { %v305_v63 = vpop.eup %304  ;;  %v130_v0 = vsub.f32 %v303_v62, %v16_v60  ;;  %v167_v28 = vmul.f32 %v303_v62, %v303_v62 }
  0x9b   :  { %v131_v1 = vsub.f32 %v305_v63, %v17_v61  ;;  %v168_v29 = vmul.f32 %v305_v63, %v305_v63  ;;  %v221_v35 = vpop.permute.xlu1 %220 }
  0x9c   :  { %vm132_vm1 = vcmp.ne.f32.partialorder %v130_v0, %v130_v0  ;;  %vm157_vm2 = vcmp.gt.f32.partialorder %v130_v0, 0.0  ;;  %vm159_vm3 = vcmp.lt.f32.partialorder %v130_v0, 0.0  ;;  %v150_v30 = vmul.f32 2.0, %v130_v0 }
  0x9d   :  { %vm133_vm4 = vcmp.ne.f32.partialorder %v131_v1, %v131_v1  ;;  %v134_v3 = vsel %vm132_vm1, 1.0, %v317_v2  ;;  %vm158_vm5 = vcmp.gt.f32.partialorder %v131_v1, 0.0  ;;  %vm160_vm6 = vcmp.lt.f32.partialorder %v131_v1, 0.0 }
  0x9e   :  { %v135_v4 = vsel %vm133_vm4, 1.0, %v317_v2  ;;  %v137_v5 = vsel %vm136_vm0, %v134_v3, -inf  ;;  %v161_v6 = vsel %vm159_vm3, -0.1, %v317_v2  ;;  %v162_v8 = vsel %vm160_vm6, -0.1, %v317_v2 }
  0x9f   :  { %v138_v7 = vsel %vm136_vm0, %v135_v4, -inf  ;;  %v163_v9 = vsel %vm157_vm2, 0.1, %v161_v6  ;;  %v164_v11 = vsel %vm158_vm5, 0.1, %v162_v8  ;;  %v151_v31 = vmul.f32 2.0, %v131_v1 }
  0xa0   :  { %v139_v10 = vmax.f32 %v137_v5, %v138_v7  ;;  %v169_v38 = vsub.f32 1.0, %v167_v28  ;;  %v170_v39 = vsub.f32 1.0, %v168_v29  ;;  %v237_v50 = vpop.permute.xlu1 %236 }
  0xa2   :  { %140 = vmax.xlane.f32.xlu0 %v139_v10 }
  0xa5   :  { %v253_v63 = vpop.permute.xlu1 %252 }
 0x12b   :  { %v141_v12 = vpop.xlane.xlu0 %140 }
 0x12c   :  { %v142_v13 = vrot.slane %v141_v12, 4 }
 0x12e   :  { %v143_v16 = vmax.f32 %v141_v12, %v142_v13 }
 0x130   :  { %v144_v19 = vrot.slane %v143_v16, 2 }
 0x132   :  { %v145_v20 = vmax.f32 %v143_v16, %v144_v19 }
 0x134   :  { %v146_v22 = vrot.slane %v145_v20, 1 }
 0x136   :  { %v147_v23 = vmax.f32 %v145_v20, %v146_v22 }
 0x138   :  { %276 = vpush %v147_v23 }
 0x169   :  { %s277_s2 = spop %276 }
 0x16a   :  { %p149_p0 = scmp.gt.f32.partialorder %s277_s2, 0.0 }
 0x16c   :  { %s152_s18 = scalar_select %p149_p0, 1, 0 }
 0x16e   :  { %v153_v32 = vstv %s152_s18 }
 0x16f   :  { %vm154_vm7 = vcmp.eq.s32.totalorder %v153_v32, 1 }
 0x170   :  { %v155_v33 = vsel %vm154_vm7, 0.0, %v150_v30  ;;  %v156_v34 = vsel %vm154_vm7, 0.0, %v151_v31 }
 0x171   :  { %v165_v36 = vadd.f32 %v163_v9, %v155_v33  ;;  %v166_v37 = vadd.f32 %v164_v11, %v156_v34 }
 0x173   :  { %v171_v40 = vmul.f32 %v169_v38, %v165_v36  ;;  %v172_v41 = vmul.f32 %v170_v39, %v166_v37 }
 0x175   :  { %v180_v42 = vrot.slane %v171_v40, %v341_v14  ;;  %v184_v43 = vrot.slane %v172_v41, %v341_v14  ;;  %v194_v44 = vrot.slane %v171_v40, %v348_v17  ;;  %v198_v45 = vrot.slane %v172_v41, %v348_v17 }
 0x176   :  { %v210_v46 = vrot.slane %v171_v40, %v354_v21  ;;  %v214_v47 = vrot.slane %v172_v41, %v354_v21  ;;  %v226_v48 = vrot.slane %v171_v40, %v358_v25  ;;  %v230_v49 = vrot.slane %v172_v41, %v358_v25 }
 0x177   :  { %v185_v51 = vmul.f32 %v180_v42, %v175_v24  ;;  %v186_v52 = vmul.f32 %v184_v43, %v175_v24  ;;  %v199_v53 = vmul.f32 %v194_v44, %v189_v26  ;;  %v200_v54 = vmul.f32 %v198_v45, %v189_v26 }
 0x178   :  { %v215_v55 = vmul.f32 %v210_v46, %v205_v27  ;;  %v216_v56 = vmul.f32 %v214_v47, %v205_v27  ;;  %v242_v58 = vrot.slane %v171_v40, %v343_v15  ;;  %v246_v17 = vrot.slane %v172_v41, %v343_v15 }
 0x179   :  { %v201_v14 = vadd.f32 %v199_v53, %v185_v51  ;;  %v202_v57 = vadd.f32 %v200_v54, %v186_v52  ;;  %v231_v59 = vmul.f32 %v226_v48, %v221_v35  ;;  %v232_v60 = vmul.f32 %v230_v49, %v221_v35 }
 0x17a   :  { %v258_v62 = vrot.slane %v171_v40, %v350_v18  ;;  %v262_v25 = vrot.slane %v172_v41, %v350_v18  ;;  %v247_v2 = vmul.f32 %v242_v58, %v237_v50  ;;  %v248_v3 = vmul.f32 %v246_v17, %v237_v50 }
 0x17b   :  { %v217_v21 = vadd.f32 %v215_v55, %v201_v14  ;;  %v218_v61 = vadd.f32 %v216_v56, %v202_v57 }
 0x17c   :  { %v263_v6 = vmul.f32 %v258_v62, %v253_v63  ;;  %v264_v7 = vmul.f32 %v262_v25, %v253_v63 }
 0x17d   :  { %v233_v0 = vadd.f32 %v231_v59, %v217_v21  ;;  %v234_v1 = vadd.f32 %v232_v60, %v218_v61 }
 0x17f   :  { %v249_v4 = vadd.f32 %v247_v2, %v233_v0  ;;  %v250_v5 = vadd.f32 %v248_v3, %v234_v1 }
 0x181   :  { %v265_v8 = vadd.f32 %v263_v6, %v249_v4  ;;  %v266_v9 = vadd.f32 %v264_v7, %v250_v5 }
 0x183   :  { %v269_v15 = vcombine.low %v265_v8, %v266_v9 }
 0x185   :  { %271 = vst [vmem:[%s394_s3] sm:$0xff] %v269_v15 }

</bundles_post_ra>
